<compile_context>
chip_gen: v7x
topology: tpu7x:2x2x1
jax: 0.10.0
libtpu: 0.0.40
codegen_flags: <defaults>
</compile_context>

<pallas_src>
import jax
import jax.numpy as jnp
from jax.experimental import pallas as pl
from jax.experimental.pallas import tpu as pltpu


def _round_up(x, m):
    return (x + m - 1) // m * m


# ----------------------------------------------------------------------------
# Kernel factory.  Grid = (num_batch_tiles, nka + nkv); k-steps [0, nka) stream
# audio tiles, k-steps [nka, nka+nkv) stream visual tiles.
#
#   audio_ref  : (TB, TK) f32   wa_ref : (TK, D) bf16
#   visual_ref : (TB, TK) f32   wv_ref : (TK, D) bf16
#   b_enc_ref  : (1, 2D)  f32   (constant, single-buffered)
#   wf_ref     : (2D, CP) f32   (constant, single-buffered)
#   bf_ref     : (1, CP)  f32   (constant, single-buffered)
#   feat_ref   : (TB, 2D) f32   packed [a | v] slab (lane-dense)
#   logits_ref : (TB, CP) f32   padded logits (lane-dense)
#   acc_ref    : (TB, 2D) f32   VMEM accumulator, persists across k-steps
# ----------------------------------------------------------------------------
def _make_kernel(nka, d):
    def kernel(audio_ref, wa_ref, visual_ref, wv_ref, b_enc_ref, wf_ref, bf_ref,
               feat_ref, logits_ref, acc_ref):
        k = pl.program_id(1)

        @pl.when(k == 0)
        def _init():
            acc_ref[...] = jnp.zeros_like(acc_ref)

        @pl.when(k < nka)
        def _audio_step():
            acc_ref[:, :d] += jnp.dot(
                audio_ref[...], wa_ref[...].astype(jnp.float32),
                preferred_element_type=jnp.float32)

        @pl.when(k >= nka)
        def _visual_step():
            acc_ref[:, d:] += jnp.dot(
                visual_ref[...], wv_ref[...].astype(jnp.float32),
                preferred_element_type=jnp.float32)

        @pl.when(k == pl.num_programs(1) - 1)
        def _finalize():
            feat = acc_ref[...] + b_enc_ref[...]          # (TB, 2D) f32
            feat_ref[...] = feat
            # ConcatFusion: concat([a, v]) @ Wf + bf  ==  feat @ Wf + bf.
            logits_ref[...] = jnp.dot(
                feat, wf_ref[...], preferred_element_type=jnp.float32) + bf_ref[...]

    return kernel


def avclassifier_forward(audio, visual, params, n_classes, feat_dim,
                         *, tk=512, tb_cap=512):
    """Fused AVClassifier forward: returns (a, v, out) like the PyTorch module.

    audio  : (B, 1, 1, T, F) float32
    visual : (B, 3, H, W)    float32
    params : (wa (Ka,D), ba (1,D), wv (Kv,D), bv (1,D), wf (2D,C), bf (1,C)) f32
    """
    wa, ba, wv, bv, wf, bf = params
    B = audio.shape[0]
    D = feat_dim
    C = n_classes

    # PyTorch: audio.squeeze(2).expand(-1, 1, -1, -1); the expand is a no-op.
    audio_flat = jnp.squeeze(audio, axis=2).reshape(B, -1).astype(jnp.float32)
    visual_flat = visual.reshape(B, -1).astype(jnp.float32)
    Ka, Kv = audio_flat.shape[1], visual_flat.shape[1]

    # ---- K tiling (contraction axis streamed through VMEM) -------------------
    tk = _round_up(max(128, min(tk, _round_up(max(Ka, Kv), 128))), 128)
    Kap, Kvp = _round_up(Ka, tk), _round_up(Kv, tk)
    nka, nkv = Kap // tk, Kvp // tk
    nk = nka + nkv

    # ---- batch tiling: >= 2 "parallel" steps once B >= 16 (v7x megacore) -----
    Bp8 = _round_up(B, 8)
    if Bp8 >= 16:
        tb = min(tb_cap, _round_up(pl.cdiv(Bp8, 2), 8))
    else:
        tb = Bp8
    Bp = _round_up(Bp8, tb)
    nb = Bp // tb

    # ---- pad / pack operands (zero padding contributes nothing) --------------
    audio_p = jnp.pad(audio_flat, ((0, Bp - B), (0, Kap - Ka)))
    visual_p = jnp.pad(visual_flat, ((0, Bp - B), (0, Kvp - Kv)))
    wa_p = jnp.pad(wa, ((0, Kap - Ka), (0, 0))).astype(jnp.bfloat16)
    wv_p = jnp.pad(wv, ((0, Kvp - Kv), (0, 0))).astype(jnp.bfloat16)
    b_enc = jnp.concatenate([ba.reshape(1, D), bv.reshape(1, D)],
                            axis=-1).astype(jnp.float32)            # (1, 2D)
    CP = _round_up(C, 128)
    wf_p = jnp.zeros((2 * D, CP), jnp.float32).at[:, :C].set(wf.astype(jnp.float32))
    bf_p = jnp.zeros((1, CP), jnp.float32).at[:, :C].set(bf.reshape(1, C))

    grid = (nb, nk)

    # index maps: clamp so the "inactive" modality's block index never changes
    # (no redundant DMA); pl.when inside the kernel selects the active modality.
    audio_spec = pl.BlockSpec((tb, tk), lambda i, k: (i, jnp.minimum(k, nka - 1)))
    wa_spec = pl.BlockSpec((tk, D), lambda i, k: (jnp.minimum(k, nka - 1), 0))
    visual_spec = pl.BlockSpec((tb, tk), lambda i, k: (i, jnp.maximum(k - nka, 0)))
    wv_spec = pl.BlockSpec((tk, D), lambda i, k: (jnp.maximum(k - nka, 0), 0))
    b_enc_spec = pl.BlockSpec((1, 2 * D), lambda i, k: (0, 0),
                              pipeline_mode=pl.Buffered(1))
    wf_spec = pl.BlockSpec((2 * D, CP), lambda i, k: (0, 0),
                           pipeline_mode=pl.Buffered(1))
    bf_spec = pl.BlockSpec((1, CP), lambda i, k: (0, 0),
                           pipeline_mode=pl.Buffered(1))

    out_specs = (
        pl.BlockSpec((tb, 2 * D), lambda i, k: (i, 0)),   # packed [a | v] slab
        pl.BlockSpec((tb, CP), lambda i, k: (i, 0)),      # padded logits
    )

    # ---- VMEM budget (explicit, with headroom; <= 48 MiB for v7x) ------------
    vmem_est = (
        4 * tb * tk * 4                     # audio + visual tiles, double-buffered
        + 4 * tk * D * 2                    # wa + wv tiles, double-buffered (bf16)
        + (2 * D + 2 * D * CP + CP) * 4     # single-buffered constants
        + 2 * (tb * 2 * D + tb * CP) * 4    # outputs, double-buffered
        + tb * 2 * D * 4                    # accumulator scratch
    )
    vmem_limit = min(max(2 * vmem_est, 32 << 20), 48 << 20)

    cost = pl.CostEstimate(
        flops=int(2 * Bp * (Kap + Kvp) * D + 2 * Bp * 2 * D * CP),
        transcendentals=0,
        bytes_accessed=int(Bp * (Kap + Kvp) * 4
                           + nb * (Kap + Kvp) * D * 2
                           + (2 * D + 2 * D * CP + CP) * 4
                           + Bp * 2 * D * 4 + Bp * CP * 4),
    )

    feat, logits = pl.pallas_call(
        _make_kernel(nka, D),
        out_shape=(
            jax.ShapeDtypeStruct((Bp, 2 * D), jnp.float32),
            jax.ShapeDtypeStruct((Bp, CP), jnp.float32),
        ),
        grid=grid,
        in_specs=[audio_spec, wa_spec, visual_spec, wv_spec,
                  b_enc_spec, wf_spec, bf_spec],
        out_specs=out_specs,
        scratch_shapes=[pltpu.VMEM((tb, 2 * D), jnp.float32)],
        compiler_params=pltpu.CompilerParams(
            dimension_semantics=("parallel", "arbitrary"),
            vmem_limit_bytes=int(vmem_limit)),
        cost_estimate=cost,
    )(audio_p, wa_p, visual_p, wv_p, b_enc, wf_p, bf_p)

    a = feat[:B, :D]
    v = feat[:B, D:2 * D]
    out = logits[:B, :C]
    return a, v, out


# ----------------------------------------------------------------------------
# Parameters (synthetic stand-ins for the pretrained AST / manet checkpoints).
# ----------------------------------------------------------------------------
def init_params(key, ka, kv, d, c):
    k = jax.random.split(key, 6)
    wa = jax.random.normal(k[0], (ka, d), jnp.float32) / jnp.sqrt(float(ka))
    ba = jax.random.normal(k[1], (1, d), jnp.float32) * 0.01
    wv = jax.random.normal(k[2], (kv, d), jnp.float32) / jnp.sqrt(float(kv))
    bv = jax.random.normal(k[3], (1, d), jnp.float32) * 0.01
    wf = jax.random.normal(k[4], (2 * d, c), jnp.float32) / jnp.sqrt(float(2 * d))
    bf = jax.random.normal(k[5], (1, c), jnp.float32) * 0.01
    return wa, ba, wv, bv, wf, bf


if __name__ == "__main__":
    key = jax.random.PRNGKey(0)
    k_audio, k_visual, k_params = jax.random.split(key, 3)

    # Small shapes consistent with the forward():
    B, T, F = 2, 16, 16          # audio spectrogram (B, 1, 1, T, F)
    H, W = 16, 16                # visual frames (B, 3, H, W)
    D = 64                       # per-modality embedding / fusion input_dim
    C = 8                        # n_classes

    audio = jax.random.normal(k_audio, (B, 1, 1, T, F), jnp.float32)
    visual = jax.random.normal(k_visual, (B, 3, H, W), jnp.float32)
    params = init_params(k_params, ka=T * F, kv=3 * H * W, d=D, c=C)

    a, v, out = avclassifier_forward(audio, visual, params,
                                     n_classes=C, feat_dim=D, tk=256)
    jax.block_until_ready((a, v, out))

    # Pure-JAX f32 reference (kernel uses f32 activations, bf16 encoder weights,
    # f32 MXU accumulation -> modest tolerance).
    wa, ba, wv, bv, wf, bf = params
    af = jnp.squeeze(audio, 2).reshape(B, -1)
    vf = visual.reshape(B, -1)
    a_ref = af @ wa + ba
    v_ref = vf @ wv + bv
    out_ref = jnp.concatenate([a_ref, v_ref], axis=-1) @ wf + bf

    assert a.shape == (B, D) and v.shape == (B, D) and out.shape == (B, C)
    assert jnp.allclose(a, a_ref, atol=2e-2, rtol=2e-2)
    assert jnp.allclose(v, v_ref, atol=2e-2, rtol=2e-2)
    assert jnp.allclose(out, out_ref, atol=2e-2, rtol=2e-2)

    print("KERNEL_OK")
</pallas_src>

<mosaic_0001>
module attributes {stable_mosaic.version = 11 : i64} {
  func.func @kernel(%arg0: i32, %arg1: i32, %arg2: memref<8x256xf32, #tpu.memory_space<vmem>>, %arg3: memref<256x64xbf16, #tpu.memory_space<vmem>>, %arg4: memref<8x256xf32, #tpu.memory_space<vmem>>, %arg5: memref<256x64xbf16, #tpu.memory_space<vmem>>, %arg6: memref<1x128xf32, #tpu.memory_space<vmem>>, %arg7: memref<128x128xf32, #tpu.memory_space<vmem>>, %arg8: memref<1x128xf32, #tpu.memory_space<vmem>>, %arg9: memref<8x128xf32, #tpu.memory_space<vmem>>, %arg10: memref<8x128xf32, #tpu.memory_space<vmem>>, %arg11: memref<8x128xf32, #tpu.memory_space<vmem>>) attributes {dimension_semantics = [#tpu.dimension_semantics<parallel>, #tpu.dimension_semantics<arbitrary>], iteration_bounds = array<i64: 1, 4>, scalar_prefetch = 0 : i64, scratch_operands = 1 : i64, tpu.core_type = #tpu.core_type<tc>, window_params = [{transform_indices = @transform_0, window_bounds = array<i64: 8, 256>}, {transform_indices = @transform_1, window_bounds = array<i64: 256, 64>}, {transform_indices = @transform_2, window_bounds = array<i64: 8, 256>}, {transform_indices = @transform_3, window_bounds = array<i64: 256, 64>}, {pipeline_mode = #tpu.pipeline_mode<synchronous>, transform_indices = @transform_4, window_bounds = array<i64: 1, 128>}, {pipeline_mode = #tpu.pipeline_mode<synchronous>, transform_indices = @transform_5, window_bounds = array<i64: 128, 128>}, {pipeline_mode = #tpu.pipeline_mode<synchronous>, transform_indices = @transform_6, window_bounds = array<i64: 1, 128>}, {transform_indices = @transform_7, window_bounds = array<i64: 8, 128>}, {transform_indices = @transform_8, window_bounds = array<i64: 8, 128>}]} {
    %c0_i32 = arith.constant 0 : i32
    %0 = arith.cmpi eq, %arg1, %c0_i32 : i32
    %1 = arith.extui %0 : i1 to i32
    %c0_i32_0 = arith.constant 0 : i32
    %2 = arith.cmpi ne, %1, %c0_i32_0 : i32
    scf.if %2 {
      %cst = arith.constant 0.000000e+00 : f32
      %12 = vector.broadcast %cst : f32 to vector<8x128xf32>
      %c0 = arith.constant 0 : index
      %c0_5 = arith.constant 0 : index
      %13 = vector.load %arg11[%c0, %c0_5] : memref<8x128xf32, #tpu.memory_space<vmem>>, vector<8x128xf32>
      tpu.vector_store %arg11[%c0, %c0_5], %12 {strides = array<i32>} : memref<8x128xf32, #tpu.memory_space<vmem>>, vector<8x128xf32>,
    } else {
    }
    %c1_i32 = arith.constant 1 : i32
    %3 = arith.cmpi slt, %arg1, %c1_i32 : i32
    %4 = arith.extui %3 : i1 to i32
    %c0_i32_1 = arith.constant 0 : i32
    %5 = arith.cmpi ne, %4, %c0_i32_1 : i32
    scf.if %5 {
      %c0 = arith.constant 0 : index
      %c0_5 = arith.constant 0 : index
      %12 = vector.load %arg11[%c0, %c0_5] : memref<8x128xf32, #tpu.memory_space<vmem>>, vector<8x64xf32>
      %c0_6 = arith.constant 0 : index
      %c0_7 = arith.constant 0 : index
      %13 = vector.load %arg2[%c0_6, %c0_7] : memref<8x256xf32, #tpu.memory_space<vmem>>, vector<8x256xf32>
      %c0_8 = arith.constant 0 : index
      %c0_9 = arith.constant 0 : index
      %14 = vector.load %arg3[%c0_8, %c0_9] : memref<256x64xbf16, #tpu.memory_space<vmem>>, vector<256x64xbf16>
      %15 = arith.extf %14 : vector<256x64xbf16> to vector<256x64xf32>
      %cst = arith.constant dense<0.000000e+00> : vector<8x64xf32>
      %16 = tpu.matmul %13, %15, %cst {dimension_numbers = #tpu.dot_dimension_numbers<[1], [0], [0], [1], [0, 0, 1, 1], [], []>} : vector<8x256xf32>, vector<256x64xf32>, vector<8x64xf32> -> vector<8x64xf32>
      %17 = arith.addf %12, %16 : vector<8x64xf32>
      %c0_10 = arith.constant 0 : index
      %c0_11 = arith.constant 0 : index
      %18 = vector.load %arg11[%c0_10, %c0_11] : memref<8x128xf32, #tpu.memory_space<vmem>>, vector<8x64xf32>
      tpu.vector_store %arg11[%c0_10, %c0_11], %17 {strides = array<i32>} : memref<8x128xf32, #tpu.memory_space<vmem>>, vector<8x64xf32>,
    } else {
    }
    %c1_i32_2 = arith.constant 1 : i32
    %6 = arith.cmpi sge, %arg1, %c1_i32_2 : i32
    %7 = arith.extui %6 : i1 to i32
    %c0_i32_3 = arith.constant 0 : i32
    %8 = arith.cmpi ne, %7, %c0_i32_3 : i32
    scf.if %8 {
      %c0 = arith.constant 0 : index
      %c64 = arith.constant 64 : index
      %12 = vector.load %arg11[%c0, %c64] : memref<8x128xf32, #tpu.memory_space<vmem>>, vector<8x64xf32>
      %c0_5 = arith.constant 0 : index
      %c0_6 = arith.constant 0 : index
      %13 = vector.load %arg4[%c0_5, %c0_6] : memref<8x256xf32, #tpu.memory_space<vmem>>, vector<8x256xf32>
      %c0_7 = arith.constant 0 : index
      %c0_8 = arith.constant 0 : index
      %14 = vector.load %arg5[%c0_7, %c0_8] : memref<256x64xbf16, #tpu.memory_space<vmem>>, vector<256x64xbf16>
      %15 = arith.extf %14 : vector<256x64xbf16> to vector<256x64xf32>
      %cst = arith.constant dense<0.000000e+00> : vector<8x64xf32>
      %16 = tpu.matmul %13, %15, %cst {dimension_numbers = #tpu.dot_dimension_numbers<[1], [0], [0], [1], [0, 0, 1, 1], [], []>} : vector<8x256xf32>, vector<256x64xf32>, vector<8x64xf32> -> vector<8x64xf32>
      %17 = arith.addf %12, %16 : vector<8x64xf32>
      %c0_9 = arith.constant 0 : index
      %c64_10 = arith.constant 64 : index
      %18 = vector.load %arg11[%c0_9, %c64_10] : memref<8x128xf32, #tpu.memory_space<vmem>>, vector<8x64xf32>
      tpu.vector_store %arg11[%c0_9, %c64_10], %17 {strides = array<i32>} : memref<8x128xf32, #tpu.memory_space<vmem>>, vector<8x64xf32>,
    } else {
    }
    %c3_i32 = arith.constant 3 : i32
    %9 = arith.cmpi eq, %arg1, %c3_i32 : i32
    %10 = arith.extui %9 : i1 to i32
    %c0_i32_4 = arith.constant 0 : i32
    %11 = arith.cmpi ne, %10, %c0_i32_4 : i32
    scf.if %11 {
      %c0 = arith.constant 0 : index
      %c0_5 = arith.constant 0 : index
      %12 = vector.load %arg11[%c0, %c0_5] : memref<8x128xf32, #tpu.memory_space<vmem>>, vector<8x128xf32>
      %c0_6 = arith.constant 0 : index
      %c0_7 = arith.constant 0 : index
      %13 = vector.load %arg6[%c0_6, %c0_7] : memref<1x128xf32, #tpu.memory_space<vmem>>, vector<1x128xf32>
      %14 = vector.broadcast %13 : vector<1x128xf32> to vector<8x128xf32>
      %15 = arith.addf %12, %14 : vector<8x128xf32>
      %c0_8 = arith.constant 0 : index
      %c0_9 = arith.constant 0 : index
      %16 = vector.load %arg9[%c0_8, %c0_9] : memref<8x128xf32, #tpu.memory_space<vmem>>, vector<8x128xf32>
      tpu.vector_store %arg9[%c0_8, %c0_9], %15 {strides = array<i32>} : memref<8x128xf32, #tpu.memory_space<vmem>>, vector<8x128xf32>,
      %c0_10 = arith.constant 0 : index
      %c0_11 = arith.constant 0 : index
      %17 = vector.load %arg7[%c0_10, %c0_11] : memref<128x128xf32, #tpu.memory_space<vmem>>, vector<128x128xf32>
      %cst = arith.constant dense<0.000000e+00> : vector<8x128xf32>
      %18 = tpu.matmul %15, %17, %cst {dimension_numbers = #tpu.dot_dimension_numbers<[1], [0], [0], [1], [0, 0, 1, 1], [], []>} : vector<8x128xf32>, vector<128x128xf32>, vector<8x128xf32> -> vector<8x128xf32>
      %c0_12 = arith.constant 0 : index
      %c0_13 = arith.constant 0 : index
      %19 = vector.load %arg8[%c0_12, %c0_13] : memref<1x128xf32, #tpu.memory_space<vmem>>, vector<1x128xf32>
      %20 = vector.broadcast %19 : vector<1x128xf32> to vector<8x128xf32>
      %21 = arith.addf %18, %20 : vector<8x128xf32>
      %c0_14 = arith.constant 0 : index
      %c0_15 = arith.constant 0 : index
      %22 = vector.load %arg10[%c0_14, %c0_15] : memref<8x128xf32, #tpu.memory_space<vmem>>, vector<8x128xf32>
      tpu.vector_store %arg10[%c0_14, %c0_15], %21 {strides = array<i32>} : memref<8x128xf32, #tpu.memory_space<vmem>>, vector<8x128xf32>,
    } else {
    }
    return
  }
  func.func @transform_0(%arg0: i32, %arg1: i32) -> (i32, i32) {
    %c0_i32 = arith.constant 0 : i32
    %0 = arith.minsi %arg1, %c0_i32 : i32
    %c0_i32_0 = arith.constant 0 : i32
    return %arg0, %0 : i32, i32
  }
  func.func @transform_1(%arg0: i32, %arg1: i32) -> (i32, i32) {
    %c0_i32 = arith.constant 0 : i32
    %0 = arith.minsi %arg1, %c0_i32 : i32
    %c0_i32_0 = arith.constant 0 : i32
    %c0_i32_1 = arith.constant 0 : i32
    return %0, %c0_i32_0 : i32, i32
  }
  func.func @transform_2(%arg0: i32, %arg1: i32) -> (i32, i32) {
    %c1_i32 = arith.constant 1 : i32
    %0 = arith.subi %arg1, %c1_i32 : i32
    %c0_i32 = arith.constant 0 : i32
    %1 = arith.maxsi %0, %c0_i32 : i32
    %c0_i32_0 = arith.constant 0 : i32
    return %arg0, %1 : i32, i32
  }
  func.func @transform_3(%arg0: i32, %arg1: i32) -> (i32, i32) {
    %c1_i32 = arith.constant 1 : i32
    %0 = arith.subi %arg1, %c1_i32 : i32
    %c0_i32 = arith.constant 0 : i32
    %1 = arith.maxsi %0, %c0_i32 : i32
    %c0_i32_0 = arith.constant 0 : i32
    %c0_i32_1 = arith.constant 0 : i32
    return %1, %c0_i32_0 : i32, i32
  }
  func.func @transform_4(%arg0: i32, %arg1: i32) -> (i32, i32) {
    %c0_i32 = arith.constant 0 : i32
    %c0_i32_0 = arith.constant 0 : i32
    %c0_i32_1 = arith.constant 0 : i32
    return %c0_i32, %c0_i32_0 : i32, i32
  }
  func.func @transform_5(%arg0: i32, %arg1: i32) -> (i32, i32) {
    %c0_i32 = arith.constant 0 : i32
    %c0_i32_0 = arith.constant 0 : i32
    %c0_i32_1 = arith.constant 0 : i32
    return %c0_i32, %c0_i32_0 : i32, i32
  }
  func.func @transform_6(%arg0: i32, %arg1: i32) -> (i32, i32) {
    %c0_i32 = arith.constant 0 : i32
    %c0_i32_0 = arith.constant 0 : i32
    %c0_i32_1 = arith.constant 0 : i32
    return %c0_i32, %c0_i32_0 : i32, i32
  }
  func.func @transform_7(%arg0: i32, %arg1: i32) -> (i32, i32) {
    %c0_i32 = arith.constant 0 : i32
    %c0_i32_0 = arith.constant 0 : i32
    return %arg0, %c0_i32 : i32, i32
  }
  func.func @transform_8(%arg0: i32, %arg1: i32) -> (i32, i32) {
    %c0_i32 = arith.constant 0 : i32
    %c0_i32_0 = arith.constant 0 : i32
    return %arg0, %c0_i32 : i32, i32
  }
}

</mosaic_0001>

<bundles_post_ra>
// kernel: tpu_custom_call.1
= control target key start
LH: loop header
LB: loop body
LE: loop exit
PB: predicated region body
PF: predicated region fallthrough
CT: control target
= control target key end

     0   :  { %14 = vsyncpa [#allocation4], 0  ;;  %s1798_s0 = inlined_call_operand.vmem [shape: f32[8,256], index: 0, kind: input, shape index: {}]   ;;  %s1799_s1 = inlined_call_operand.vmem [shape: bf16[256,64], index: 1, kind: input, shape index: {}]   ;;  %s1800_s2 = inlined_call_operand.vmem [shape: f32[8,768], index: 2, kind: input, shape index: {}]   ;;  %s1801_s3 = inlined_call_operand.vmem [shape: bf16[768,64], index: 3, kind: input, shape index: {}]   ;;  %s1802_s4 = inlined_call_operand.vmem [shape: f32[1,128], index: 4, kind: input, shape index: {}]   ;;  %s1803_s5 = inlined_call_operand.vmem [shape: f32[128,128], index: 5, kind: input, shape index: {}]   ;;  %s1804_s6 = inlined_call_operand.vmem [shape: f32[1,128], index: 6, kind: input, shape index: {}]   ;;  %s1805_s7 = inlined_call_operand.hbm [shape: f32[8,128], index: 7, kind: output, shape index: {0}]   ;;  %s1806_s8 = inlined_call_operand.hbm [shape: f32[8,128], index: 8, kind: output, shape index: {1}]  }
   0x1   :  { %15 = vsyncpa [#allocation6], 0  ;;  %s1594_s27 = smov 0   ;;  %s1596_s28 = smov 0  }
   0x2   :  { %s1598_s29 = smov 0  }
   0x3 LB: > { %s1017_s30 = sadd.s32 4294967295, %s1540_s29   ;;  %s30_s9 = sadd.s32 1, %s1536_s28  ;;  %s1540_s29 = sphi %s1598_s29, %s21_s29   ;;  %s1536_s28 = sphi %s1596_s28, %s1809_s28   ;;  %s1532_s27 = sphi %s1594_s27, %s1808_s27  }
   0x4   : > { %p31_p0 = scmp.ge.s32.totalorder %s30_s9, 4  ;;  %p1024_p1 = scmp.ge.s32.totalorder %s1540_s29, 1 }
   0x5   : > { %p365_p2 = scmp.lt.s32.totalorder %s1540_s29, 5 }
   0x6   : > { %s1811_s9 = smov (%p31_p0, %s30_s9), 0 }
   0x7   : > { %p366_p3 = pnand %p1024_p1, %p365_p2 }
   0x8   : > { %p427_p4 = scmp.lt.s32.totalorder (!%p366_p3), %s1532_s27, 0  ;;  %s1029_s10 = sadd.s32 (!%p366_p3), 4294967295, %s1532_s27 }
   0x9   : > { %369 = sbr.rel (%p366_p3) target bundleno = 949 (0x3b5), region = 48  ;;  %p452_p5 = scmp.gt.s32.totalorder (!%p366_p3), %s1029_s10, 0 }
   0xa   : > { %p1035_p10 = scmp.ne.s32.totalorder (!%p366_p3), %s1532_s27, 0 }
  0x10   : > { %s428_s11 = scalar_select %p427_p4, %s1532_s27, 0 }
  0x11   : > { %s1813_s10 = smov (!%p452_p5, %s1029_s10), 0  ;;  %v1542_v0 = vmov (!%p1035_p10), 0.0  }
  0x12   : > { %s1025_s12 = sshll.u32 %s428_s11, 1  ;;  %s1027_s13 = sshll.u32 %s428_s11, 5  ;;  %483 = vst [vmem:[#allocation2] sm:$0xff] (!%p1035_p10), %v1542_v0 }
  0x13   : > { %p432_p6 = scmp.lt.s32.totalorder %s1025_s12, 1  ;;  %p444_p7 = scmp.lt.s32.totalorder %s1027_s13, 31 }
  0x14   : > { %s1030_s14 = sshll.u32 %s1813_s10, 1  ;;  %s1033_s15 = sshll.u32 %s1813_s10, 5 }
  0x15   : > { %s1815_s12 = smov (!%p432_p6, %s1025_s12), 1  ;;  %s1817_s13 = smov (!%p444_p7, %s1027_s13), 31 }
  0x16   : > { %s1026_s16 = sshll.u32 %s1815_s12, 3  ;;  %p457_p8 = scmp.lt.s32.totalorder %s1030_s14, 5 }
  0x17   : > { %s1621_s19 = scalar_lea.vmem %s1798_s0, %s1026_s16  ;;  %s1028_s20 = sshll.u32 %s1817_s13, 2 }
  0x18   : > { %s1626_s23 = scalar_lea.vmem %s1799_s1, %s1028_s20  ;;  %p471_p9 = scmp.lt.s32.totalorder %s1033_s15, 95 }
  0x19   : > { %s1819_s14 = smov (!%p457_p8, %s1030_s14), 5  ;;  %482 = sbr.rel (%p1035_p10) target bundleno = 32 (0x20), region = 52 }
  0x1a   : > { %s1821_s15 = smov (!%p471_p9, %s1033_s15), 95  ;;  %s1031_s24 = sshll.u32 %s1819_s14, 3 }
  0x1b   : > { %s1631_s10 = scalar_lea.vmem %s1800_s2, %s1031_s24  ;;  %s1034_s11 = sshll.u32 %s1821_s15, 2 }
  0x1c   : > { %s1636_s16 = scalar_lea.vmem %s1801_s3, %s1034_s11 }
  0x20 PF: > { %p1036_p11 = scmp.ge.s32.totalorder %s1532_s27, 1 }
  0x21   : > { %v1182_v1 = vld [vmem:[%s1626_s23 + $0x40] sm:$0xff] (!%p1036_p11)   ;;  %v1183_v3 = vld [vmem:[%s1626_s23 + $0x48] sm:$0xff] (!%p1036_p11)   ;;  %v1184_v5 = vld [vmem:[%s1626_s23 + $0x50] sm:$0xff] (!%p1036_p11)   ;;  %vm626_vm0 = vcmask (!%p1036_p11), 523264  }
  0x22   : > { %487 = sbr.rel (%p1036_p11) target bundleno = 284 (0x11c), region = 56  ;;  %v1048_v2 = vld [vmem:[%s1626_s23] sm:$0xff] (!%p1036_p11)   ;;  %1328 = vmatprep.subr.bf16.mxu0 (!%p1036_p11), %v1182_v1  ;;  %v1175_v4 = vld [vmem:[%s1626_s23 + $0x8] sm:$0xff] (!%p1036_p11)   ;;  %v1176_v7 = vld [vmem:[%s1626_s23 + $0x10] sm:$0xff] (!%p1036_p11)  }
  0x23   : > { %1330 = vmatpush3.bf16.msra.mxu0 (!%p1036_p11), %v1048_v2  ;;  %v490_v6 = vld [vmem:[%s1621_s19 + $0x8] sm:$0xff] (!%p1036_p11)  ;;  %v1185_v8 = vld [vmem:[%s1626_s23 + $0x58] sm:$0xff] (!%p1036_p11)   ;;  %v1186_v10 = vld [vmem:[%s1626_s23 + $0x60] sm:$0xff] (!%p1036_p11)  }
  0x24   : > { %1332 = vmatprep.subr.bf16.mxu0 (!%p1036_p11), %v1183_v3  ;;  %619 = vmatprep.mubr.f32.mxu0 (!%p1036_p11), %v490_v6  ;;  %v1177_v9 = vld [vmem:[%s1626_s23 + $0x18] sm:$0xff] (!%p1036_p11)   ;;  %v1178_v11 = vld [vmem:[%s1626_s23 + $0x20] sm:$0xff] (!%p1036_p11)   ;;  %v1187_v12 = vld [vmem:[%s1626_s23 + $0x68] sm:$0xff] (!%p1036_p11)  }
  0x25   : > { %v1179_v13 = vld [vmem:[%s1626_s23 + $0x28] sm:$0xff] (!%p1036_p11)   ;;  %v1188_v14 = vld [vmem:[%s1626_s23 + $0x70] sm:$0xff] (!%p1036_p11)   ;;  %v1189_v16 = vld [vmem:[%s1626_s23 + $0x78] sm:$0xff] (!%p1036_p11)  }
  0x26   : > { %v1180_v15 = vld [vmem:[%s1626_s23 + $0x30] sm:$0xff] (!%p1036_p11)   ;;  %v1181_v17 = vld [vmem:[%s1626_s23 + $0x38] sm:$0xff] (!%p1036_p11)   ;;  %v489_v18 = vld [vmem:[%s1621_s19] sm:$0xff] (!%p1036_p11) }
  0x27   : > { %1334 = vmatpush3.bf16.msra.mxu0 (!%p1036_p11), %v1175_v4  ;;  %v488_v20 = vld [vmem:[#allocation2] sm:$0xff] (!%p1036_p11) }
  0x28   : > { %1336 = vmatprep.subr.bf16.mxu0 (!%p1036_p11), %v1184_v5 }
  0x2b   : > { %1338 = vmatpush3.bf16.msra.mxu0 %v1176_v7 }
  0x2c   : > { %1340 = vmatprep.subr.bf16.mxu0 %v1185_v8 }
  0x2f   : > { %1342 = vmatpush3.bf16.msra.mxu0 %v1177_v9 }
  0x30   : > { %1344 = vmatprep.subr.bf16.mxu0 %v1186_v10 }
  0x33   : > { %1346 = vmatpush3.bf16.msra.mxu0 %v1178_v11 }
  0x34   : > { %1348 = vmatprep.subr.bf16.mxu0 %v1187_v12 }
  0x37   : > { %1350 = vmatpush3.bf16.msra.mxu0 %v1179_v13 }
  0x38   : > { %1352 = vmatprep.subr.bf16.mxu0 %v1188_v14 }
  0x3b   : > { %1354 = vmatpush3.bf16.msra.mxu0 %v1180_v15 }
  0x3c   : > { %1356 = vmatprep.subr.bf16.mxu0 %v1189_v16 }
  0x3f   : > { %1358 = vmatpush3.bf16.msra.mxu0 %v1181_v17 }
  0x42   : > { %620 = vmatmul.mubr.f32.vlgmr.msra.gmra.mrb[0].mxu0 %v489_v18 }
 0x115   : > { %v1237_v19 = vpop.f32.mrb[0].mxu0 }
 0x116   : > { %v1238_v21 = vpop.f32.mrb[1].mxu0 }
 0x117   : > { %v1239_v22 = vadd.f32 %v1238_v21, %v1237_v19 }
 0x119   : > { %v625_v23 = vadd.f32 %v1239_v22, %v488_v20 }
 0x11b   : > { %627 = vst.msk [vmem:[#allocation2] sm:$0xff] %vm626_vm0, %v625_v23 }
 0x11c PF: > { %p1037_p12 = scmp.lt.s32.totalorder %s1532_s27, 1 }
 0x11d   : > { %v1197_v24 = vld [vmem:[%s1636_s16 + $0x40] sm:$0xff] (!%p1037_p12)   ;;  %v1198_v26 = vld [vmem:[%s1636_s16 + $0x48] sm:$0xff] (!%p1037_p12)   ;;  %v1199_v28 = vld [vmem:[%s1636_s16 + $0x50] sm:$0xff] (!%p1037_p12)   ;;  %s1543_s13 = smov (!%p1037_p12), 64   ;;  %vm774_vm1 = vcmask (!%p1037_p12), 1048064  }
 0x11e   : > { %631 = sbr.rel (%p1037_p12) target bundleno = 651 (0x28b), region = 60  ;;  %v1112_v25 = vld [vmem:[%s1636_s16] sm:$0xff] (!%p1037_p12)   ;;  %1360 = vmatprep.subr.bf16.mxu0 (!%p1037_p12), %v1197_v24  ;;  %v1190_v27 = vld [vmem:[%s1636_s16 + $0x8] sm:$0xff] (!%p1037_p12)   ;;  %v1191_v30 = vld [vmem:[%s1636_s16 + $0x10] sm:$0xff] (!%p1037_p12)  }
 0x11f   : > { %1362 = vmatpush3.bf16.msra.mxu0 (!%p1037_p12), %v1112_v25  ;;  %v634_v29 = vld [vmem:[%s1631_s10 + $0x8] sm:$0xff] (!%p1037_p12)  ;;  %v1200_v31 = vld [vmem:[%s1636_s16 + $0x58] sm:$0xff] (!%p1037_p12)   ;;  %v1201_v33 = vld [vmem:[%s1636_s16 + $0x60] sm:$0xff] (!%p1037_p12)  }
 0x120   : > { %1364 = vmatprep.subr.bf16.mxu0 (!%p1037_p12), %v1198_v26  ;;  %763 = vmatprep.mubr.f32.mxu0 (!%p1037_p12), %v634_v29  ;;  %v1192_v32 = vld [vmem:[%s1636_s16 + $0x18] sm:$0xff] (!%p1037_p12)   ;;  %v1193_v34 = vld [vmem:[%s1636_s16 + $0x20] sm:$0xff] (!%p1037_p12)   ;;  %v1202_v35 = vld [vmem:[%s1636_s16 + $0x68] sm:$0xff] (!%p1037_p12)  }
 0x121   : > { %v1194_v36 = vld [vmem:[%s1636_s16 + $0x28] sm:$0xff] (!%p1037_p12)   ;;  %v1203_v37 = vld [vmem:[%s1636_s16 + $0x70] sm:$0xff] (!%p1037_p12)   ;;  %v1204_v39 = vld [vmem:[%s1636_s16 + $0x78] sm:$0xff] (!%p1037_p12)  }
 0x122   : > { %v1195_v38 = vld [vmem:[%s1636_s16 + $0x30] sm:$0xff] (!%p1037_p12)   ;;  %v1196_v40 = vld [vmem:[%s1636_s16 + $0x38] sm:$0xff] (!%p1037_p12)   ;;  %v633_v41 = vld [vmem:[%s1631_s10] sm:$0xff] (!%p1037_p12) }
 0x123   : > { %1366 = vmatpush3.bf16.msra.mxu0 (!%p1037_p12), %v1190_v27  ;;  %v632_v45 = vld [vmem:[#allocation2] sm:$0xff] (!%p1037_p12) }
 0x124   : > { %1368 = vmatprep.subr.bf16.mxu0 (!%p1037_p12), %v1199_v28 }
 0x127   : > { %1370 = vmatpush3.bf16.msra.mxu0 %v1191_v30 }
 0x128   : > { %1372 = vmatprep.subr.bf16.mxu0 %v1200_v31 }
 0x12b   : > { %1374 = vmatpush3.bf16.msra.mxu0 %v1192_v32 }
 0x12c   : > { %1376 = vmatprep.subr.bf16.mxu0 %v1201_v33 }
 0x12f   : > { %1378 = vmatpush3.bf16.msra.mxu0 %v1193_v34 }
 0x130   : > { %1380 = vmatprep.subr.bf16.mxu0 %v1202_v35 }
 0x133   : > { %1382 = vmatpush3.bf16.msra.mxu0 %v1194_v36 }
 0x134   : > { %1384 = vmatprep.subr.bf16.mxu0 %v1203_v37 }
 0x137   : > { %1386 = vmatpush3.bf16.msra.mxu0 %v1195_v38 }
 0x138   : > { %1388 = vmatprep.subr.bf16.mxu0 %v1204_v39 }
 0x13b   : > { %1390 = vmatpush3.bf16.msra.mxu0 %v1196_v40 }
 0x13e   : > { %764 = vmatmul.mubr.f32.vlgmr.msra.gmra.mrb[0].mxu0 %v633_v41 }
 0x211   : > { %v1272_v42 = vpop.f32.mrb[0].mxu0 }
 0x212   : > { %v1273_v43 = vpop.f32.mrb[1].mxu0 }
 0x213   : > { %v1274_v44 = vadd.f32 %v1273_v43, %v1272_v42 }
 0x215   : > { %770 = vrot.lane.b32.xlu0 %v1274_v44, %s1543_s13 }
 0x287   : > { %v771_v46 = vpop.permute.xlu0 %770 }
 0x288   : > { %v773_v47 = vadd.f32 %v771_v46, %v632_v45 }
 0x28a   : > { %775 = vst.msk [vmem:[#allocation2] sm:$0xff] %vm774_vm1, %v773_v47 }
 0x28b PF: > { %p1038_p13 = scmp.ne.s32.totalorder %s1532_s27, 3 }
 0x28c   : > { %v790_v48 = vld [vmem:[%s1803_s5] sm:$0xff] (!%p1038_p13)  ;;  %v791_v49 = vld [vmem:[%s1803_s5 + $0x8] sm:$0xff] (!%p1038_p13)  ;;  %v792_v50 = vld [vmem:[%s1803_s5 + $0x10] sm:$0xff] (!%p1038_p13)  ;;  %v1544_v51 = vmov (!%p1038_p13), 0.0|0.0   ;;  %vm1545_vm2 = vmmov (!%p1038_p13), 0   ;;  %v1546_v54 = vmov (!%p1038_p13), 0.0  }
 0x28d   : > { %779 = sbr.rel (%p1038_p13) target bundleno = 901 (0x385), region = 64  ;;  %1391 = vmatprep.subr.bf16.mxu0 (!%p1038_p13), %v1544_v51  ;;  %v1392_v52 = vpack.c.bf16 (!%p1038_p13), %v791_v49, %v790_v48  ;;  %v793_v53 = vld [vmem:[%s1803_s5 + $0x18] sm:$0xff] (!%p1038_p13)  ;;  %1324 = vmatprep.mubr.msk.f32.mxu0 (!%p1038_p13), %vm1545_vm2, %v1546_v54  ;;  %v794_v56 = vld [vmem:[%s1803_s5 + $0x20] sm:$0xff] (!%p1038_p13)  ;;  %v795_v57 = vld [vmem:[%s1803_s5 + $0x28] sm:$0xff] (!%p1038_p13) }
 0x28e   : > { %v1395_v55 = vpack.c.bf16 (!%p1038_p13), %v793_v53, %v792_v50  ;;  %v1039_v59 = vld [vmem:[%s1802_s4] ss:$0 sm:$0xff] (!%p1038_p13)  ;;  %v1398_v61 = vpack.c.bf16 (!%p1038_p13), %v795_v57, %v794_v56  ;;  %v796_v62 = vld [vmem:[%s1803_s5 + $0x30] sm:$0xff] (!%p1038_p13)  ;;  %v797_v63 = vld [vmem:[%s1803_s5 + $0x38] sm:$0xff] (!%p1038_p13) }
 0x28f   : > { %1393 = vmatpush3.bf16.msra.mxu0 (!%p1038_p13), %v1392_v52  ;;  %v1401_v0 = vpack.c.bf16 (!%p1038_p13), %v797_v63, %v796_v62  ;;  %v798_v1 = vld [vmem:[%s1803_s5 + $0x40] sm:$0xff] (!%p1038_p13)  ;;  %v799_v2 = vld [vmem:[%s1803_s5 + $0x48] sm:$0xff] (!%p1038_p13)  ;;  %v800_v4 = vld [vmem:[%s1803_s5 + $0x50] sm:$0xff] (!%p1038_p13) }
 0x290   : > { %1394 = vmatprep.subr.bf16.mxu0 (!%p1038_p13), %v1544_v51  ;;  %v1404_v3 = vpack.c.bf16 (!%p1038_p13), %v799_v2, %v798_v1  ;;  %v801_v5 = vld [vmem:[%s1803_s5 + $0x58] sm:$0xff] (!%p1038_p13)  ;;  %v802_v7 = vld [vmem:[%s1803_s5 + $0x60] sm:$0xff] (!%p1038_p13)  ;;  %v803_v8 = vld [vmem:[%s1803_s5 + $0x68] sm:$0xff] (!%p1038_p13) }
 0x291   : > { %v780_v58 = vld [vmem:[#allocation2] sm:$0xff] (!%p1038_p13)  ;;  %v1407_v6 = vpack.c.bf16 (!%p1038_p13), %v801_v5, %v800_v4  ;;  %v1410_v9 = vpack.c.bf16 (!%p1038_p13), %v803_v8, %v802_v7  ;;  %v804_v10 = vld [vmem:[%s1803_s5 + $0x70] sm:$0xff] (!%p1038_p13)  ;;  %v805_v11 = vld [vmem:[%s1803_s5 + $0x78] sm:$0xff] (!%p1038_p13) }
 0x292   : > { %v788_v60 = vadd.f32 (!%p1038_p13), %v1039_v59, %v780_v58  ;;  %v1413_v12 = vpack.c.bf16 (!%p1038_p13), %v805_v11, %v804_v10  ;;  %v1040_v13 = vld [vmem:[%s1804_s6] ss:$0 sm:$0xff] (!%p1038_p13) }
 0x293   : > { %1396 = vmatpush3.bf16.msra.mxu0 (!%p1038_p13), %v1395_v55 }
 0x294   : > { %1397 = vmatprep.subr.bf16.mxu0 %v1544_v51  ;;  %789 = vst [vmem:[#allocation3] sm:$0xff] %v788_v60 }
 0x297   : > { %1399 = vmatpush3.bf16.msra.mxu0 %v1398_v61 }
 0x298   : > { %1400 = vmatprep.subr.bf16.mxu0 %v1544_v51 }
 0x29b   : > { %1402 = vmatpush3.bf16.msra.mxu0 %v1401_v0 }
 0x29c   : > { %1403 = vmatprep.subr.bf16.mxu0 %v1544_v51 }
 0x29f   : > { %1405 = vmatpush3.bf16.msra.mxu0 %v1404_v3 }
 0x2a0   : > { %1406 = vmatprep.subr.bf16.mxu0 %v1544_v51 }
 0x2a3   : > { %1408 = vmatpush3.bf16.msra.mxu0 %v1407_v6 }
 0x2a4   : > { %1409 = vmatprep.subr.bf16.mxu0 %v1544_v51 }
 0x2a7   : > { %1411 = vmatpush3.bf16.msra.mxu0 %v1410_v9 }
 0x2a8   : > { %1412 = vmatprep.subr.bf16.mxu0 %v1544_v51 }
 0x2ab   : > { %1414 = vmatpush3.bf16.msra.mxu0 %v1413_v12 }
 0x2ae   : > { %1325 = vmatmul.mubr.f32.vlgmr.msra.gmra.mrb[0].mxu0 %v788_v60 }
 0x381   : > { %v879_v14 = vpop.f32.mrb[0].mxu0 }
 0x382   : > { %v880_v15 = vadd.f32 %v1040_v13, %v879_v14  ;;  %v1326_v16 = vpop.f32.mrb[1].mxu0 }
 0x384   : > { %883 = vst [vmem:[#allocation5] sm:$0xff] %v880_v15 }
 0x385 PF: > { %p1734_p0 = scmp.eq.s32.totalorder %s1017_s30, 3  ;;  %s1547_s15 = smov [#allocation3]  }
 0x386   : > { %s893_s18 = sshll.u32 %s1547_s15, 4  ;;  %s1548_s19 = smov [#allocation5]   ;;  %s894_s18 = int_to_ptr.vmem [resolvable:$true] %s893_s18 }
 0x387   : > { %s906_s20 = sshll.u32 %s1548_s19, 4  ;;  %s1458_s21 = scalar_lea.vmem %s894_s18, 128  ;;  %s1738_s20 = int_to_ptr.vmem [resolvable:$true] %s906_s20 }
 0x388   : > { %p1459_p1 = scmp.ne.s32.totalorder %s894_s18, %s1458_s21  ;;  %p1465_p4 = scmp.lt.s32.totalorder %s894_s18, %s894_s18 }
 0x389   : > { %p1466_p5 = scmp.lt.s32.totalorder %s1458_s21, %s1458_s21 }
 0x38a   : > { %p1460_p2 = pnand %p1459_p1, %p1734_p0 }
 0x38b   : > { %p1467_p6 = por %p1466_p5, %p1465_p4 }
 0x38c   : > { %p1461_p3 = pneg %p1460_p2 }
 0x38e   : > { %p1468_p7 = pnand %p1467_p6, %p1461_p3 }
 0x390   : > { %1471 = shalt.err (!%p1468_p7)
}
 0x391   : > { %s1472_s23 = scalar_lea.hbm %s1805_s7, 128 }
 0x392   : > { %p1473_p8 = scmp.ne.s32.totalorder %s1805_s7, %s1472_s23  ;;  %p1478_p11 = scmp.lt.u32.totalorder %s1472_s23, %s1805_s7 }
 0x394   : > { %p1474_p9 = pnand %p1473_p8, %p1734_p0 }
 0x396   : > { %p1475_p10 = pneg %p1474_p9 }
 0x398   : > { %p1480_p12 = pnand %p1478_p11, %p1475_p10 }
 0x39a   : > { %1483 = shalt.err (!%p1480_p12)
}
 0x39b   : > { %1416 = dma.vmem_to_hbm [thread:$0]  (%p1734_p0), %s894_s18, 128, %s1805_s7, [#allocation4]  }
 0x39c   : > { %s1484_s12 = scalar_lea.vmem %s1738_s20, 128  ;;  %p1491_p3 = scmp.lt.s32.totalorder %s1738_s20, %s1738_s20 }
 0x39d   : > { %p1485_p13 = scmp.ne.s32.totalorder %s1738_s20, %s1484_s12  ;;  %p1492_p4 = scmp.lt.s32.totalorder %s1484_s12, %s1484_s12 }
 0x39f   : > { %p1486_p1 = pnand %p1485_p13, %p1734_p0  ;;  %p1493_p5 = por %p1492_p4, %p1491_p3 }
 0x3a1   : > { %p1487_p2 = pneg %p1486_p1 }
 0x3a3   : > { %p1494_p6 = pnand %p1493_p5, %p1487_p2 }
 0x3a5   : > { %1497 = shalt.err (!%p1494_p6)
}
 0x3a6   : > { %s1498_s13 = scalar_lea.hbm %s1806_s8, 128 }
 0x3a7   : > { %p1499_p7 = scmp.ne.s32.totalorder %s1806_s8, %s1498_s13  ;;  %p1504_p10 = scmp.lt.u32.totalorder %s1498_s13, %s1806_s8 }
 0x3a9   : > { %p1500_p8 = pnand %p1499_p7, %p1734_p0 }
 0x3ab   : > { %p1501_p9 = pneg %p1500_p8 }
 0x3ad   : > { %p1506_p11 = pnand %p1504_p10, %p1501_p9 }
 0x3af   : > { %1509 = shalt.err (!%p1506_p11)
}
 0x3b0   : > { %1418 = dma.vmem_to_hbm [thread:$0]  (%p1734_p0), %s1738_s20, 128, %s1806_s8, [#allocation6]  }
 0x3b1   : > { %1523 = dma.done.wait (%p1734_p0), [#allocation4], 128  }
 0x3b2   : > { %1525 = vsyncadd (%p1734_p0), [#allocation4], 4294967168 }
 0x3b3   : > { %1527 = dma.done.wait (%p1734_p0), [#allocation6], 128  }
 0x3b4   : > { %1529 = vsyncadd (%p1734_p0), [#allocation6], 4294967168 }
 0x3b5 PF: > { %s21_s29 = sadd.s32 1, %s1540_s29   ;;  %s1808_s27 = smov %s1536_s28 }
 0x3b6   : > { %p18_p12 = scmp.ge.s32.totalorder %s21_s29, 6   ;;  %s1809_s28 = smov %s1811_s9 }
 0x3b8   :  { %20 = sbr.rel (!%p18_p12) target bundleno = 3 (0x3), region = 110 }
 0x3bf   :  { %923 = vsyncpa [#allocation4], 1 }
 0x3c0   :  { %925 = vsyncpa [#allocation4 + $0x1], 1 }
 0x3c1   :  { %926 = vsyncpa [#allocation6], 1 }

</bundles_post_ra>
